<compile_context>
chip_gen: v5e
topology: v5e:2x2
jax: 0.10.0
libtpu: 0.0.40
codegen_flags: <defaults>
</compile_context>

<pallas_src>
import functools

import jax
import jax.numpy as jnp
from jax import lax
from jax.experimental import pallas as pl
from jax.experimental.pallas import tpu as pltpu


def basic_block_kernel(H, x_ref, w1_ref, w2_ref, sh_ref, out_ref):
    # x_ref:  (M, W*C)     f32   M = images_per_step * H rows; also the residual
    # w1_ref: (3*W*C, W*P) bf16  conv1 weights, banded over width, BN1 scale folded
    # w2_ref: (3*W*P, W*P) bf16  conv2 weights, banded over width, BN2 scale folded
    # sh_ref: (2, W*P)     f32   additive BN shifts (beta - mean*scale), tiled over W
    # out_ref:(M, W*P)     f32   lane-dense output
    x = x_ref[...]                                   # f32, also the residual
    M = x.shape[0]

    # Per-image boundary masks for the height shifts (encode the H zero padding).
    h = lax.broadcasted_iota(jnp.int32, x.shape, 0) % H
    top = h == 0            # first row of each image: no row above
    bot = h == H - 1        # last row of each image:  no row below

    sh = sh_ref[...]

    def conv3x3(a, w_ref):
        # Height shifts on the XLU (roll) + VPU mask; width taps and the width
        # zero padding are encoded in the banded weights.  One fused K=3*W*C
        # matmul per conv (bf16 operands, f32 accumulation).
        a_up = jnp.where(top, 0.0, pltpu.roll(a, shift=1, axis=0))      # row h-1
        a_dn = jnp.where(bot, 0.0, pltpu.roll(a, shift=M - 1, axis=0))  # row h+1
        a3 = jnp.concatenate([a_up, a, a_dn], axis=-1).astype(jnp.bfloat16)
        return jnp.dot(a3, w_ref[...], preferred_element_type=jnp.float32)

    # conv1 (BN1 scale folded) -> + shift1 -> relu          (f32 epilogue)
    y = jnp.maximum(conv3x3(x, w1_ref) + sh[0:1, :], 0.0)
    # conv2 (BN2 scale folded) -> + shift2 -> + residual -> relu
    z = conv3x3(y, w2_ref) + sh[1:2, :] + x
    out_ref[...] = jnp.maximum(z, 0.0).astype(out_ref.dtype)


def basic_block_forward(x_nchw, w1, w2, bn1, bn2, eps=1e-5, images_per_step=None):
    """x_nchw: (N, C, H, W) f32; w*: (O, I, 3, 3); bn* = (gamma, beta, mean, var)."""
    N, C, H, W = x_nchw.shape
    P = w1.shape[0]
    assert w1.shape == (P, C, 3, 3) and w2.shape == (P, P, 3, 3)
    assert C == P, "BasicBlock with downsample=None requires inplanes == planes"

    if images_per_step is None:
        # Prefer >= min(4, N) grid steps: keeps the auto-pipeliner busy and lets
        # dimension_semantics=("parallel",) use both v7x TensorCores.
        target = min(4, N)
        images_per_step = 1
        for cand in range(N, 0, -1):
            if N % cand == 0 and N // cand >= target:
                images_per_step = cand
                break
    nb = images_per_step
    assert N % nb == 0
    M = nb * H

    # NCHW -> row-major image rows (N*H, W*C); lane-dense when W*C % 128 == 0.
    x2d = jnp.transpose(x_nchw, (0, 2, 3, 1)).reshape(N * H, W * C)

    # Fold inference BN: multiplicative scale goes into the conv weights, the
    # additive shift stays as a (W*P,) vector (all done once at trace time).
    def fold(bn):
        gamma, beta, mean, var = bn
        sc = gamma / jnp.sqrt(var + eps)
        shft = beta - mean * sc
        return sc, jnp.tile(shft, W).astype(jnp.float32)         # (P,), (W*P,)

    sc1, sh1 = fold(bn1)
    sc2, sh2 = fold(bn2)
    shifts = jnp.stack([sh1, sh2])                               # (2, W*P) f32

    # Banded weights with BN scale folded in:
    #   Big[kh][w*Cin + c, v*P + p] = sc[p] * w[p, c, kh, (w - v) + 1]
    # for |w - v| <= 1, else 0 (the band encodes the width zero padding).
    # The three kh slabs are stacked along K to match concat([up, mid, down]).
    def banded(wgt, sc):
        wgt = wgt * sc[:, None, None, None]                      # scale out-chan
        wt = jnp.transpose(wgt, (2, 3, 1, 0))                    # (kh, kw, Cin, P)
        slabs = []
        for kh in range(3):
            m = sum(jnp.kron(jnp.eye(W, W, k=1 - kw, dtype=jnp.float32),
                             wt[kh, kw]) for kw in range(3))
            slabs.append(m)
        return jnp.concatenate(slabs, axis=0).astype(jnp.bfloat16)  # (3*W*Cin, W*P)

    w1b = banded(w1, sc1)
    w2b = banded(w2, sc2)

    out2d = pl.pallas_call(
        functools.partial(basic_block_kernel, H),
        out_shape=jax.ShapeDtypeStruct((N * H, W * P), x_nchw.dtype),
        grid_spec=pltpu.PrefetchScalarGridSpec(
            num_scalar_prefetch=0,
            grid=(N // nb,),
            in_specs=[
                pl.BlockSpec((M, W * C), lambda i: (i, 0)),
                # Grid-invariant weights / shifts (constant index_map); tiny here.
                pl.BlockSpec((3 * W * C, W * P), lambda i: (0, 0)),
                pl.BlockSpec((3 * W * P, W * P), lambda i: (0, 0)),
                pl.BlockSpec((2, W * P), lambda i: (0, 0)),
            ],
            out_specs=pl.BlockSpec((M, W * P), lambda i: (i, 0)),
        ),
        compiler_params=pltpu.CompilerParams(
            dimension_semantics=("parallel",),
            vmem_limit_bytes=32 * 1024 * 1024),
    )(x2d, w1b, w2b, shifts)

    return jnp.transpose(out2d.reshape(N, H, W, P), (0, 3, 1, 2))   # back to NCHW


def reference_forward(x, w1, w2, bn1, bn2, eps=1e-5):
    def conv(a, w):
        return lax.conv_general_dilated(a, w, (1, 1), ((1, 1), (1, 1)),
                                        dimension_numbers=('NCHW', 'OIHW', 'NCHW'))

    def bn(a, params):
        gamma, beta, mean, var = (p.reshape(1, -1, 1, 1) for p in params)
        return (a - mean) / jnp.sqrt(var + eps) * gamma + beta

    out = jax.nn.relu(bn(conv(x, w1), bn1))
    out = bn(conv(out, w2), bn2)
    return jax.nn.relu(out + x)


if __name__ == "__main__":
    N, C, H, W = 2, 8, 16, 16          # inplanes == planes == 8 (downsample=None)
    P = C

    key = jax.random.PRNGKey(0)
    kx, kw1, kw2, kg1, kb1, km1, kv1, kg2, kb2, km2, kv2 = jax.random.split(key, 11)

    x = jax.random.normal(kx, (N, C, H, W), jnp.float32)
    w1 = 0.1 * jax.random.normal(kw1, (P, C, 3, 3), jnp.float32)
    w2 = 0.1 * jax.random.normal(kw2, (P, P, 3, 3), jnp.float32)

    bn1 = (1.0 + 0.1 * jax.random.normal(kg1, (P,), jnp.float32),
           0.1 * jax.random.normal(kb1, (P,), jnp.float32),
           0.1 * jax.random.normal(km1, (P,), jnp.float32),
           1.0 + 0.05 * jnp.abs(jax.random.normal(kv1, (P,), jnp.float32)))
    bn2 = (1.0 + 0.1 * jax.random.normal(kg2, (P,), jnp.float32),
           0.1 * jax.random.normal(kb2, (P,), jnp.float32),
           0.1 * jax.random.normal(km2, (P,), jnp.float32),
           1.0 + 0.05 * jnp.abs(jax.random.normal(kv2, (P,), jnp.float32)))

    out = basic_block_forward(x, w1, w2, bn1, bn2)
    out = jax.block_until_ready(out)

    ref = reference_forward(x, w1, w2, bn1, bn2)
    assert out.shape == (N, C, H, W)
    # Tolerance accounts for bf16 matmul operands (accumulation stays f32).
    err = jnp.max(jnp.abs(out - ref))
    assert jnp.allclose(out, ref, atol=5e-2, rtol=5e-2), f"max abs err {err}"

    print("KERNEL_OK")
</pallas_src>

<mosaic_0001>
module attributes {stable_mosaic.version = 11 : i64} {
  func.func @basic_block_kernel(%arg0: i32, %arg1: memref<16x128xf32, #tpu.memory_space<vmem>>, %arg2: memref<384x128xbf16, #tpu.memory_space<vmem>>, %arg3: memref<384x128xbf16, #tpu.memory_space<vmem>>, %arg4: memref<2x128xf32, #tpu.memory_space<vmem>>, %arg5: memref<16x128xf32, #tpu.memory_space<vmem>>) attributes {dimension_semantics = [#tpu.dimension_semantics<parallel>], iteration_bounds = array<i64: 2>, scalar_prefetch = 0 : i64, scratch_operands = 0 : i64, tpu.core_type = #tpu.core_type<tc>, window_params = [{transform_indices = @transform_0, window_bounds = array<i64: 16, 128>}, {pipeline_mode = #tpu.pipeline_mode<synchronous>, transform_indices = @transform_1, window_bounds = array<i64: 384, 128>}, {pipeline_mode = #tpu.pipeline_mode<synchronous>, transform_indices = @transform_2, window_bounds = array<i64: 384, 128>}, {pipeline_mode = #tpu.pipeline_mode<synchronous>, transform_indices = @transform_3, window_bounds = array<i64: 2, 128>}, {transform_indices = @transform_4, window_bounds = array<i64: 16, 128>}]} {
    %c0 = arith.constant 0 : index
    %c0_0 = arith.constant 0 : index
    %0 = vector.load %arg1[%c0, %c0_0] : memref<16x128xf32, #tpu.memory_space<vmem>>, vector<16x128xf32>
    %1 = tpu.iota {dimensions = array<i32: 0>} : vector<16x128xi32>
    %c16_i32 = arith.constant 16 : i32
    %c0_i32 = arith.constant 0 : i32
    %2 = arith.cmpi eq, %c16_i32, %c0_i32 : i32
    %c1_i32 = arith.constant 1 : i32
    %3 = arith.select %2, %c1_i32, %c16_i32 : i32
    %4 = vector.broadcast %3 : i32 to vector<16x128xi32>
    %5 = arith.remsi %1, %4 : vector<16x128xi32>
    %c0_i32_1 = arith.constant 0 : i32
    %6 = vector.broadcast %c0_i32_1 : i32 to vector<16x128xi32>
    %7 = arith.cmpi ne, %5, %6 : vector<16x128xi32>
    %c0_i32_2 = arith.constant 0 : i32
    %8 = vector.broadcast %c0_i32_2 : i32 to vector<16x128xi32>
    %9 = arith.cmpi slt, %5, %8 : vector<16x128xi32>
    %c0_i32_3 = arith.constant 0 : i32
    %10 = arith.cmpi slt, %3, %c0_i32_3 : i32
    %11 = vector.broadcast %10 : i1 to vector<16x128xi1>
    %12 = vector.broadcast %11 : vector<16x128xi1> to vector<16x128xi1>
    %13 = arith.xori %9, %12 : vector<16x128xi1>
    %14 = arith.andi %13, %7 : vector<16x128xi1>
    %15 = vector.broadcast %3 : i32 to vector<16x128xi32>
    %16 = arith.addi %5, %15 : vector<16x128xi32>
    %17 = arith.select %14, %16, %5 : vector<16x128xi1>, vector<16x128xi32>
    %c0_i32_4 = arith.constant 0 : i32
    %18 = vector.broadcast %c0_i32_4 : i32 to vector<16x128xi32>
    %19 = arith.cmpi eq, %17, %18 : vector<16x128xi32>
    %c15_i32 = arith.constant 15 : i32
    %20 = vector.broadcast %c15_i32 : i32 to vector<16x128xi32>
    %21 = arith.cmpi eq, %17, %20 : vector<16x128xi32>
    %c0_5 = arith.constant 0 : index
    %c0_6 = arith.constant 0 : index
    %22 = vector.load %arg4[%c0_5, %c0_6] : memref<2x128xf32, #tpu.memory_space<vmem>>, vector<2x128xf32>
    %c1_i32_7 = arith.constant 1 : i32
    %23 = tpu.dynamic_rotate %0 by %c1_i32_7 dim 0 : vector<16x128xf32>, i32 -> vector<16x128xf32>
    %cst = arith.constant 0.000000e+00 : f32
    %24 = vector.broadcast %cst : f32 to vector<16x128xf32>
    %25 = arith.select %19, %24, %23 : vector<16x128xi1>, vector<16x128xf32>
    %c15_i32_8 = arith.constant 15 : i32
    %26 = tpu.dynamic_rotate %0 by %c15_i32_8 dim 0 : vector<16x128xf32>, i32 -> vector<16x128xf32>
    %cst_9 = arith.constant 0.000000e+00 : f32
    %27 = vector.broadcast %cst_9 : f32 to vector<16x128xf32>
    %28 = arith.select %21, %27, %26 : vector<16x128xi1>, vector<16x128xf32>
    %29 = tpu.concatenate %25, %0, %28 in 1 : vector<16x128xf32>, vector<16x128xf32>, vector<16x128xf32> -> vector<16x384xf32>
    %30 = arith.truncf %29 : vector<16x384xf32> to vector<16x384xbf16>
    %c0_10 = arith.constant 0 : index
    %c0_11 = arith.constant 0 : index
    %31 = vector.load %arg2[%c0_10, %c0_11] : memref<384x128xbf16, #tpu.memory_space<vmem>>, vector<384x128xbf16>
    %cst_12 = arith.constant dense<0.000000e+00> : vector<16x128xf32>
    %32 = tpu.matmul %30, %31, %cst_12 {dimension_numbers = #tpu.dot_dimension_numbers<[1], [0], [0], [1], [0, 0, 1, 1], [], []>} : vector<16x384xbf16>, vector<384x128xbf16>, vector<16x128xf32> -> vector<16x128xf32>
    %33 = vector.extract_strided_slice %22 {offsets = [0, 0], sizes = [1, 128], strides = [1, 1]} : vector<2x128xf32> to vector<1x128xf32>
    %34 = vector.broadcast %33 : vector<1x128xf32> to vector<16x128xf32>
    %35 = arith.addf %32, %34 : vector<16x128xf32>
    %cst_13 = arith.constant 0.000000e+00 : f32
    %36 = vector.broadcast %cst_13 : f32 to vector<16x128xf32>
    %37 = arith.maximumf %35, %36 : vector<16x128xf32>
    %c1_i32_14 = arith.constant 1 : i32
    %38 = tpu.dynamic_rotate %37 by %c1_i32_14 dim 0 : vector<16x128xf32>, i32 -> vector<16x128xf32>
    %cst_15 = arith.constant 0.000000e+00 : f32
    %39 = vector.broadcast %cst_15 : f32 to vector<16x128xf32>
    %40 = arith.select %19, %39, %38 : vector<16x128xi1>, vector<16x128xf32>
    %c15_i32_16 = arith.constant 15 : i32
    %41 = tpu.dynamic_rotate %37 by %c15_i32_16 dim 0 : vector<16x128xf32>, i32 -> vector<16x128xf32>
    %cst_17 = arith.constant 0.000000e+00 : f32
    %42 = vector.broadcast %cst_17 : f32 to vector<16x128xf32>
    %43 = arith.select %21, %42, %41 : vector<16x128xi1>, vector<16x128xf32>
    %44 = tpu.concatenate %40, %37, %43 in 1 : vector<16x128xf32>, vector<16x128xf32>, vector<16x128xf32> -> vector<16x384xf32>
    %45 = arith.truncf %44 : vector<16x384xf32> to vector<16x384xbf16>
    %c0_18 = arith.constant 0 : index
    %c0_19 = arith.constant 0 : index
    %46 = vector.load %arg3[%c0_18, %c0_19] : memref<384x128xbf16, #tpu.memory_space<vmem>>, vector<384x128xbf16>
    %cst_20 = arith.constant dense<0.000000e+00> : vector<16x128xf32>
    %47 = tpu.matmul %45, %46, %cst_20 {dimension_numbers = #tpu.dot_dimension_numbers<[1], [0], [0], [1], [0, 0, 1, 1], [], []>} : vector<16x384xbf16>, vector<384x128xbf16>, vector<16x128xf32> -> vector<16x128xf32>
    %48 = vector.extract_strided_slice %22 {offsets = [1, 0], sizes = [1, 128], strides = [1, 1]} : vector<2x128xf32> to vector<1x128xf32>
    %49 = vector.broadcast %48 : vector<1x128xf32> to vector<16x128xf32>
    %50 = arith.addf %47, %49 : vector<16x128xf32>
    %51 = arith.addf %50, %0 : vector<16x128xf32>
    %cst_21 = arith.constant 0.000000e+00 : f32
    %52 = vector.broadcast %cst_21 : f32 to vector<16x128xf32>
    %53 = arith.maximumf %51, %52 : vector<16x128xf32>
    %c0_22 = arith.constant 0 : index
    %c0_23 = arith.constant 0 : index
    %54 = vector.load %arg5[%c0_22, %c0_23] : memref<16x128xf32, #tpu.memory_space<vmem>>, vector<16x128xf32>
    tpu.vector_store %arg5[%c0_22, %c0_23], %53 {strides = array<i32>} : memref<16x128xf32, #tpu.memory_space<vmem>>, vector<16x128xf32>,
    return
  }
  func.func @transform_0(%arg0: i32) -> (i32, i32) {
    %c0_i32 = arith.constant 0 : i32
    %c0_i32_0 = arith.constant 0 : i32
    return %arg0, %c0_i32 : i32, i32
  }
  func.func @transform_1(%arg0: i32) -> (i32, i32) {
    %c0_i32 = arith.constant 0 : i32
    %c0_i32_0 = arith.constant 0 : i32
    %c0_i32_1 = arith.constant 0 : i32
    return %c0_i32, %c0_i32_0 : i32, i32
  }
  func.func @transform_2(%arg0: i32) -> (i32, i32) {
    %c0_i32 = arith.constant 0 : i32
    %c0_i32_0 = arith.constant 0 : i32
    %c0_i32_1 = arith.constant 0 : i32
    return %c0_i32, %c0_i32_0 : i32, i32
  }
  func.func @transform_3(%arg0: i32) -> (i32, i32) {
    %c0_i32 = arith.constant 0 : i32
    %c0_i32_0 = arith.constant 0 : i32
    %c0_i32_1 = arith.constant 0 : i32
    return %c0_i32, %c0_i32_0 : i32, i32
  }
  func.func @transform_4(%arg0: i32) -> (i32, i32) {
    %c0_i32 = arith.constant 0 : i32
    %c0_i32_0 = arith.constant 0 : i32
    return %arg0, %c0_i32 : i32, i32
  }
}

</mosaic_0001>

<bundles_post_ra>
// kernel: tpu_custom_call.1
= control target key start
LH: loop header
LB: loop body
LE: loop exit
PB: predicated region body
PF: predicated region fallthrough
CT: control target
= control target key end

     0   :  { %9 = vsyncpa [#allocation3], 0  ;;  %s1655_s0 = inlined_call_operand.hbm [shape: f32[32,128], index: 0, kind: input, shape index: {}]   ;;  %s1656_s1 = inlined_call_operand.hbm [shape: bf16[384,128], index: 1, kind: input, shape index: {}]   ;;  %s1657_s2 = inlined_call_operand.hbm [shape: bf16[384,128], index: 2, kind: input, shape index: {}]   ;;  %s1658_s3 = inlined_call_operand.vmem [shape: f32[2,128], index: 3, kind: input, shape index: {}]   ;;  %s1659_s4 = inlined_call_operand.hbm [shape: f32[32,128], index: 4, kind: output, shape index: {}]  }
   0x1   :  { %11 = vsyncpa [#allocation3 + $0x1], 0 }
   0x2   :  { %12 = vsyncpa [#allocation6], 0 }
   0x3   :  { %13 = vsyncpa [#allocation4], 0 }
   0x4   :  { %15 = vsyncpa [#allocation4 + $0x1], 0  ;;  %s1453_s15 = smov 0   ;;  %s1455_s16 = smov 0  }
   0x5   :  { %s1457_s17 = smov 0   ;;  %s1459_s18 = smov 0  }
   0x6 LB: > { %s1474_s19 = sadd.s32 4294967295, %s1417_s18   ;;  %s905_s20 = sadd.s32 4294967294, %s1417_s18   ;;  %s1417_s18 = sphi %s1459_s18, %s1673_s18   ;;  %s1413_s17 = sphi %s1457_s17, %s1672_s17   ;;  %s1409_s16 = sphi %s1455_s16, %s1671_s16   ;;  %s1405_s15 = sphi %s1453_s15, %s1670_s15  }
   0x7   : > { %p41_p0 = scmp.ne.s32.totalorder %s1409_s16, %s1405_s15  ;;  %p42_p1 = scmp.eq.s32.totalorder %s1474_s19, 0 }
   0x8   : > { %p128_p2 = scmp.eq.s32.totalorder %s1474_s19, 1  ;;  %p134_p3 = scmp.eq.s32.totalorder %s905_s20, 1 }
   0x9   : > { %p1483_p4 = por %p42_p1, %p41_p0  ;;  %p906_p5 = scmp.ge.s32.totalorder %s1417_s18, 1 }
   0xa   : > { %p1488_p6 = por %p134_p3, %p41_p0  ;;  %p141_p7 = scmp.lt.s32.totalorder %s1417_s18, 3 }
   0xb   : > { %s152_s25 = sshll.u32 %s1656_s1, 4  ;;  %s1419_s27 = smov [#allocation5]   ;;  %s153_s25 = int_to_ptr.hbm [resolvable:$true] %s152_s25 }
   0xc   : > { %p1496_p8 = pnand %p906_p5, %p141_p7  ;;  %s154_s28 = sshll.u32 %s1419_s27, 4  ;;  %s155_s28 = int_to_ptr.vmem [resolvable:$true] %s154_s28 }
   0xd   : > { %s166_s5 = sshll.u32 %s1657_s2, 4  ;;  %s1420_s6 = smov 64   ;;  %s167_s5 = int_to_ptr.hbm [resolvable:$true] %s166_s5 }
   0xe   : > { %p1195_p9 = pneg %p1496_p8  ;;  %s1421_s7 = smov 4  }
   0xf   : > { %s1422_s8 = smov [#allocation7]   ;;  %s1509_s10 = sadd.s32 1, %s1417_s18  }
  0x10   : > { %p1196_p10 = pnand %p1195_p9, %p42_p1  ;;  %s168_s9 = sshll.u32 %s1422_s8, 4  ;;  %s169_s9 = int_to_ptr.vmem [resolvable:$true] %s168_s9 }
  0x11   : > { %s28_s11 = sadd.s32 1, %s1413_s17  ;;  %s25_s12 = ssub.s32 %s1417_s18, %s1509_s10 }
  0x12   : > { %1198 = dma.hbm_to_vmem [thread:$0]  (!%p1196_p10), %s153_s25, 3072, %s155_s28, [#allocation6], %s1420_s6, %s1420_s6, %s1421_s7  }
  0x13   : > { %1201 = dma.hbm_to_vmem [thread:$0]  (!%p1196_p10), %s167_s5, 3072, %s169_s9, [#allocation6], %s1420_s6, %s1420_s6, %s1421_s7  }
  0x14   : > { %p35_p12 = scmp.ne.s32.totalorder %s1413_s17, %s1409_s16  ;;  %p26_p13 = scmp.eq.s32.totalorder %s25_s12, 0 }
  0x15   : > { %p36_p0 = scmp.eq.s32.totalorder %s1417_s18, 0  ;;  %p1212_p5 = scmp.lt.s32.totalorder %s1417_s18, 2 }
  0x16   : > { %p1519_p3 = por %p128_p2, %p35_p12  ;;  %s185_s20 = sand.u32 1, %s1413_s17  }
  0x17   : > { %s1525_s14 = scalar_select %p26_p13, %s1413_s17, %s28_s11  }
  0x18   : > { %p37_p7 = por %p36_p0, %p35_p12  ;;  %s910_s23 = sshll.u32 %s185_s20, 4 }
  0x19   : > { %s1131_s24 = sshll.u32 %s1417_s18, 4  ;;  %s189_s29 = scalar_lea.vmem [#allocation2], %s910_s23 }
  0x1a   : > { %s194_s28 = scalar_lea.hbm %s1655_s0, %s1131_s24  ;;  %s197_s30 = sshll.u32 %s189_s29, 4  ;;  %s198_s30 = int_to_ptr.vmem [resolvable:$true] %s197_s30 }
  0x1b   : > { %s195_s5 = sshll.u32 %s194_s28, 4  ;;  %p1532_p2 = pnand %p1212_p5, %p37_p7  ;;  %s196_s5 = int_to_ptr.hbm [resolvable:$true] %s195_s5 }
  0x1c   : > { %s186_s7 = scalar_lea.sflag [#allocation3], %s185_s20  ;;  %s1317_s8 = sshra.s32 %s196_s5, 4  ;;  %s1318_s8 = int_to_ptr.hbm [resolvable:$true] %s1317_s8 }
  0x1d   : > { %s1319_s9 = scalar_lea.hbm %s1318_s8, 16  ;;  %p1321_p10 = pneg %p1532_p2 }
  0x1e   : > { %p1320_p9 = scmp.ne.s32.totalorder %s1318_s8, %s1319_s9  ;;  %s1324_s23 = scalar_lea.hbm %s1655_s0, 32 }
  0x1f   : > { %p1325_p0 = scmp.lt.s32.totalorder %s1318_s8, %s1655_s0  ;;  %p1326_p5 = scmp.lt.s32.totalorder %s1324_s23, %s1319_s9 }
  0x20   : > { %p1322_p12 = pnand %p1321_p10, %p1320_p9 }
  0x21   : > { %p1327_p7 = por %p1326_p5, %p1325_p0 }
  0x22   : > { %p1323_p13 = pneg %p1322_p12 }
  0x24   : > { %p1328_p11 = pnand %p1327_p7, %p1323_p13 }
  0x26   : > { %1331 = shalt.err (!%p1328_p11)
}
  0x27   : > { %s1423_s20 = smov 128   ;;  %s1424_s27 = smov 8  }
  0x28   : > { %1205 = dma.hbm_to_vmem [thread:$0]  (!%p1532_p2), %s196_s5, 256, %s198_s30, %s186_s7, %s1423_s20, %s1423_s20, %s1424_s27  }
  0x29   : > { %209 = sbr.rel (%p1496_p8) target bundleno = 386 (0x182), region = 36  ;;  %s1549_s28 = sand.u32 (!%p1496_p8), 1, %s1409_s16  }
  0x2a   : > { %s914_s29 = sshll.u32 (!%p1496_p8), %s1549_s28, 4  ;;  %s212_s8 = scalar_lea.sflag (!%p1496_p8), [#allocation3], %s1549_s28 }
  0x2b   : > { %s1555_s9 = scalar_lea.vmem (!%p1496_p8), [#allocation2], %s914_s29 }
  0x2e   : > { %1392 = dma.done.wait (%p1483_p4), %s212_s8, 256  }
  0x2f   : > { %1394 = vsyncadd (%p1483_p4), %s212_s8, 4294967040 }
  0x30   : > { %1396 = dma.done.wait (%p42_p1), [#allocation6], 6144  }
  0x31   : > { %1398 = vsyncadd (%p42_p1), [#allocation6], 4294961152  ;;  %v1139_v0 = vld [vmem:[#allocation5 + $0x38] sm:$0xff]  ;;  %v1138_v3 = vld [vmem:[#allocation5 + $0x30] sm:$0xff]  ;;  %v255_v14 = vlaneseq  ;;  %vm1425_vm4 = vmmov 1   ;;  %s1180_s30 = sshll.u32 %s1474_s19, 4 }
  0x32   : > { %v1147_v1 = vld [vmem:[#allocation5 + $0x78] sm:$0xff]  ;;  %497 = vmatpush.bf16.msra.mxu0 %v1139_v0  ;;  %v1146_v4 = vld [vmem:[#allocation5 + $0x70] sm:$0xff]  ;;  %v1137_v6 = vld [vmem:[#allocation5 + $0x28] sm:$0xff]  ;;  %s809_s7 = scalar_lea.hbm %s1659_s4, %s1180_s30  ;;  %s250_s11 = scalar_lea.vmem [#allocation8], %s914_s29 }
  0x33   : > { %v1155_v2 = vld [vmem:[#allocation5 + $0xb8] sm:$0xff]  ;;  %511 = vmatpush.bf16.msra.mxu1 %v1147_v1  ;;  %v1154_v5 = vld [vmem:[#allocation5 + $0xb0] sm:$0xff]  ;;  %v1145_v7 = vld [vmem:[#allocation5 + $0x68] sm:$0xff]  ;;  %v1565_v18 = vshrl.u32 %v255_v14, 7  ;;  %s810_s12 = sshll.u32 %s250_s11, 4  ;;  %s812_s23 = sshll.u32 %s809_s7, 4  ;;  %s811_s12 = int_to_ptr.vmem [resolvable:$true] %s810_s12  ;;  %s813_s23 = int_to_ptr.hbm [resolvable:$true] %s812_s23 }
  0x34   : > { %525 = vmatpush.bf16.msra.mxu2 %v1155_v2  ;;  %v1153_v8 = vld [vmem:[#allocation5 + $0xa8] sm:$0xff]  ;;  %v1163_v9 = vld [vmem:[#allocation7 + $0x38] sm:$0xff]  ;;  %v1136_v10 = vld [vmem:[#allocation5 + $0x20] sm:$0xff]  ;;  %s798_s19 = scalar_lea.sflag [#allocation4], %s1549_s28  ;;  %s1361_s24 = sshra.s32 %s813_s23, 4  ;;  %s1362_s24 = int_to_ptr.hbm [resolvable:$true] %s1361_s24 }
  0x35   : > { %v1144_v11 = vld [vmem:[#allocation5 + $0x60] sm:$0xff]  ;;  %749 = vmatpush.bf16.msra.mxu3 %v1163_v9  ;;  %v1162_v13 = vld [vmem:[#allocation7 + $0x30] sm:$0xff]  ;;  %v1135_v15 = vld [vmem:[#allocation5 + $0x18] sm:$0xff]  ;;  %v257_v24 = vadd.s32 8, %v1565_v18  ;;  %v262_v30 = vand.u32 15, %v1565_v18  ;;  %vm289_vm0 = vcmp.lt.s32.totalorder %v1565_v18, 1  ;;  %p1368_p11 = scmp.lt.s32.totalorder %s1362_s24, %s1659_s4 }
  0x36   : > { %498 = vmatpush.bf16.msra.mxu0 %v1138_v3  ;;  %v1152_v12 = vld [vmem:[#allocation5 + $0xa0] sm:$0xff]  ;;  %v1143_v16 = vld [vmem:[#allocation5 + $0x58] sm:$0xff]  ;;  %v1134_v19 = vld [vmem:[#allocation5 + $0x10] sm:$0xff]  ;;  %vm296_vm1 = vcmp.lt.s32.totalorder %v1565_v18, 7  ;;  %s1363_s25 = scalar_lea.hbm %s1362_s24, 16  ;;  %s1367_s29 = scalar_lea.hbm %s1659_s4, 32 }
  0x37   : > { %512 = vmatpush.bf16.msra.mxu1 %v1146_v4  ;;  %v1151_v17 = vld [vmem:[#allocation5 + $0x98] sm:$0xff]  ;;  %v1142_v20 = vld [vmem:[#allocation5 + $0x50] sm:$0xff]  ;;  %v1133_v25 = vld [vmem:[#allocation5 + $0x8] sm:$0xff]  ;;  %v269_v33 = vand.u32 15, %v257_v24  ;;  %vm1181_vm2 = vcmp.ne.s32.totalorder %v262_v30, 0  ;;  %p1364_p1 = scmp.ne.s32.totalorder %s1362_s24, %s1363_s25  ;;  %p1369_p2 = scmp.lt.s32.totalorder %s1367_s29, %s1363_s25 }
  0x38   : > { %526 = vmatpush.bf16.msra.mxu2 %v1154_v5  ;;  %v1150_v21 = vld [vmem:[#allocation5 + $0x90] sm:$0xff]  ;;  %v1571_v23 = vld [vmem:[%s1555_s9 + $0x8] sm:$0xff]  ;;  %v1132_v34 = vld [vmem:[#allocation5] sm:$0xff] }
  0x39   : > { %750 = vmatpush.bf16.msra.mxu3 %v1162_v13  ;;  %v1568_v22 = vld [vmem:[%s1555_s9] sm:$0xff]  ;;  %v1141_v26 = vld [vmem:[#allocation5 + $0x48] sm:$0xff]  ;;  %v288_v28 = vrot.slane %v1571_v23, 7  ;;  %v295_v32 = vrot.slane %v1571_v23, 1  ;;  %v1171_v41 = vld [vmem:[#allocation7 + $0x78] sm:$0xff]  ;;  %vm1182_vm3 = vcmp.ne.s32.totalorder %v269_v33, 15  ;;  %p1365_p4 = pnand %p1364_p1, %p1519_p3  ;;  %p1370_p9 = por %p1369_p2, %p1368_p11 }
  0x3a   : > { %499 = vmatpush.bf16.msra.mxu0 %v1137_v6  ;;  %v287_v27 = vrot.slane %v1568_v22, 7  ;;  %v1149_v29 = vld [vmem:[#allocation5 + $0x88] sm:$0xff]  ;;  %v294_v31 = vrot.slane %v1568_v22, 1  ;;  %v1140_v35 = vld [vmem:[#allocation5 + $0x40] sm:$0xff]  ;;  %v1179_v42 = vld [vmem:[#allocation7 + $0xb8] sm:$0xff]  ;;  %v302_v44 = vpack.c.bf16 %v1571_v23, %v1568_v22 }
  0x3b   : > { %513 = vmatpush.bf16.msra.mxu1 %v1145_v7  ;;  %v1148_v38 = vld [vmem:[#allocation5 + $0x80] sm:$0xff]  ;;  %vm1591_vm5 = vmpackc.low %vm1425_vm4, %vm1181_vm2  ;;  %v1170_v48 = vld [vmem:[#allocation7 + $0x70] sm:$0xff]  ;;  %p1366_p8 = pneg %p1365_p4 }
  0x3c   : > { %527 = vmatpush.bf16.msra.mxu2 %v1153_v8  ;;  %v290_v36 = vsel %vm289_vm0, %v287_v27, %v288_v28  ;;  %v291_v37 = vsel %vm289_vm0, %v288_v28, %v287_v27  ;;  %v297_v39 = vsel %vm296_vm1, %v294_v31, %v295_v32  ;;  %v298_v40 = vsel %vm296_vm1, %v295_v32, %v294_v31  ;;  %vm1595_vm6 = vmpackc.low %vm1182_vm3, %vm1425_vm4  ;;  %v1178_v49 = vld [vmem:[#allocation7 + $0xb0] sm:$0xff]  ;;  %v1169_v50 = vld [vmem:[#allocation7 + $0x68] sm:$0xff] }
  0x3d   : > { %v1016_v43 = vpack.c.bf16 %v290_v36, %v291_v37  ;;  %v1020_v46 = vpack.c.bf16 %v298_v40, %v297_v39  ;;  %v1161_v51 = vld [vmem:[#allocation7 + $0x28] sm:$0xff]  ;;  %v1168_v53 = vld [vmem:[#allocation7 + $0x60] sm:$0xff]  ;;  %v1167_v56 = vld [vmem:[#allocation7 + $0x58] sm:$0xff]  ;;  %p1371_p10 = pnand %p1370_p9, %p1366_p8 }
  0x3e   : > { %500 = vmatpush.bf16.msra.mxu0 %v1136_v10  ;;  %v1177_v52 = vld [vmem:[#allocation7 + $0xa8] sm:$0xff]  ;;  %751 = vmatpush.bf16.msra.mxu3 %v1161_v51  ;;  %v1160_v54 = vld [vmem:[#allocation7 + $0x20] sm:$0xff]  ;;  %v1159_v57 = vld [vmem:[#allocation7 + $0x18] sm:$0xff] }
  0x3f   : > { %514 = vmatpush.bf16.msra.mxu1 %v1144_v11  ;;  %v1176_v55 = vld [vmem:[#allocation7 + $0xa0] sm:$0xff]  ;;  %v1175_v58 = vld [vmem:[#allocation7 + $0x98] sm:$0xff]  ;;  %v1166_v59 = vld [vmem:[#allocation7 + $0x50] sm:$0xff] }
  0x40   : > { %528 = vmatpush.bf16.msra.mxu2 %v1152_v12  ;;  %v1158_v60 = vld [vmem:[#allocation7 + $0x10] sm:$0xff]  ;;  %v1165_v62 = vld [vmem:[#allocation7 + $0x48] sm:$0xff]  ;;  %v1164_v1 = vld [vmem:[#allocation7 + $0x40] sm:$0xff] }
  0x41   : > { %v1174_v61 = vld [vmem:[#allocation7 + $0x90] sm:$0xff]  ;;  %v1157_v63 = vld [vmem:[#allocation7 + $0x8] sm:$0xff]  ;;  %v1156_v2 = vld [vmem:[#allocation7] sm:$0xff] }
  0x42   : > { %501 = vmatpush.bf16.msra.mxu0 %v1135_v15  ;;  %752 = vmatpush.bf16.msra.mxu3 %v1160_v54  ;;  %v1173_v0 = vld [vmem:[#allocation7 + $0x88] sm:$0xff]  ;;  %v1172_v3 = vld [vmem:[#allocation7 + $0x80] sm:$0xff] }
  0x43   : > { %515 = vmatpush.bf16.msra.mxu1 %v1143_v16  ;;  %v286_v4 = vld [vmem:[%s1658_s3] sm:$0x3] }
  0x44   : > { %529 = vmatpush.bf16.msra.mxu2 %v1151_v17  ;;  %v352_v5 = vperm.slane %v286_v4, 0 }
  0x46   : > { %502 = vmatpush.bf16.msra.mxu0 %v1134_v19  ;;  %753 = vmatpush.bf16.msra.mxu3 %v1159_v57 }
  0x47   : > { %516 = vmatpush.bf16.msra.mxu1 %v1142_v20 }
  0x48   : > { %530 = vmatpush.bf16.msra.mxu2 %v1150_v21 }
  0x4a   : > { %503 = vmatpush.bf16.msra.mxu0 %v1133_v25  ;;  %754 = vmatpush.bf16.msra.mxu3 %v1158_v60 }
  0x4b   : > { %517 = vmatpush.bf16.msra.mxu1 %v1141_v26 }
  0x4c   : > { %531 = vmatpush.bf16.msra.mxu2 %v1149_v29 }
  0x4e   : > { %504 = vmatpush.bf16.msra.mxu0 %v1132_v34  ;;  %755 = vmatpush.bf16.msra.mxu3 %v1157_v63  ;;  %v604_v34 = vperm.slane %v286_v4, 1 }
  0x4f   : > { %518 = vmatpush.bf16.msra.mxu1 %v1140_v35 }
  0x50   : > { %532 = vmatpush.bf16.msra.mxu2 %v1148_v38 }
  0x51   : > { %1017 = vmatmul.msk.bf16.vlgmr.msra.gmra.mxu0 %vm1591_vm5, %v1016_v43 }
  0x52   : > { %763 = vmatpush.bf16.msrb.mxu0 %v1171_v41  ;;  %519 = vmatmul.bf16.vlgmr.msra.gmra.mxu1 %v302_v44 }
  0x53   : > { %777 = vmatpush.bf16.msrb.mxu1 %v1179_v42  ;;  %1021 = vmatmul.msk.bf16.vlgmr.msra.gmra.mxu2 %vm1595_vm6, %v1020_v46 }
  0x54   : > { %756 = vmatpush.bf16.msra.mxu3 %v1156_v2 }
  0x56   : > { %764 = vmatpush.bf16.msrb.mxu0 %v1170_v48 }
  0x57   : > { %778 = vmatpush.bf16.msrb.mxu1 %v1178_v49 }
  0x5a   : > { %765 = vmatpush.bf16.msrb.mxu0 %v1169_v50 }
  0x5b   : > { %779 = vmatpush.bf16.msrb.mxu1 %v1177_v52 }
  0x5e   : > { %766 = vmatpush.bf16.msrb.mxu0 %v1168_v53 }
  0x5f   : > { %780 = vmatpush.bf16.msrb.mxu1 %v1176_v55 }
  0x62   : > { %767 = vmatpush.bf16.msrb.mxu0 %v1167_v56 }
  0x63   : > { %781 = vmatpush.bf16.msrb.mxu1 %v1175_v58 }
  0x66   : > { %768 = vmatpush.bf16.msrb.mxu0 %v1166_v59 }
  0x67   : > { %782 = vmatpush.bf16.msrb.mxu1 %v1174_v61 }
  0x6a   : > { %769 = vmatpush.bf16.msrb.mxu0 %v1165_v62 }
  0x6b   : > { %783 = vmatpush.bf16.msrb.mxu1 %v1173_v0 }
  0x6e   : > { %770 = vmatpush.bf16.msrb.mxu0 %v1164_v1 }
  0x6f   : > { %784 = vmatpush.bf16.msrb.mxu1 %v1172_v3 }
  0xce   : > { %v506_v6 = vpop.f32.mrf.mxu0 }
  0xcf   : > { %v507_v7 = vadd.f32 %v506_v6, %v352_v5  ;;  %v520_v8 = vpop.f32.mrf.mxu1 }
  0xd1   : > { %v521_v9 = vadd.f32 %v520_v8, %v507_v7 }
  0xd6   : > { %v534_v10 = vpop.f32.mrf.mxu2  ;;  %v508_v11 = vpop.f32.mrf.mxu0 }
  0xd7   : > { %v509_v12 = vadd.f32 %v508_v11, %v352_v5  ;;  %v535_v13 = vadd.f32 %v534_v10, %v521_v9  ;;  %v522_v14 = vpop.f32.mrf.mxu1 }
  0xd9   : > { %v523_v15 = vadd.f32 %v522_v14, %v509_v12  ;;  %v539_v16 = vmax.f32 %v535_v13, 0.0 }
  0xdb   : > { %v541_v21 = vrot.slane %v539_v16, 7  ;;  %v547_v24 = vrot.slane %v539_v16, 1 }
  0xde   : > { %v536_v17 = vpop.f32.mrf.mxu2 }
  0xdf   : > { %v537_v19 = vadd.f32 %v536_v17, %v523_v15 }
  0xe1   : > { %v540_v20 = vmax.f32 %v537_v19, 0.0 }
  0xe3   : > { %v542_v25 = vrot.slane %v540_v20, 7  ;;  %v548_v26 = vrot.slane %v540_v20, 1  ;;  %v554_v27 = vpack.c.bf16 %v540_v20, %v539_v16 }
  0xe5   : > { %771 = vmatmul.bf16.vlgmr.msrb.gmra.mxu0 %v554_v27  ;;  %v543_v28 = vsel %vm289_vm0, %v541_v21, %v542_v25  ;;  %v544_v29 = vsel %vm289_vm0, %v542_v25, %v541_v21  ;;  %v549_v30 = vsel %vm296_vm1, %v547_v24, %v548_v26  ;;  %v550_v31 = vsel %vm296_vm1, %v548_v26, %v547_v24 }
  0xe6   : > { %v1120_v32 = vpack.c.bf16 %v543_v28, %v544_v29  ;;  %v1124_v33 = vpack.c.bf16 %v550_v31, %v549_v30 }
  0xe8   : > { %1121 = vmatmul.msk.bf16.vlgmr.msra.gmra.mxu3 %vm1591_vm5, %v1120_v32  ;;  %1125 = vmatmul.msk.bf16.vlgmr.msrb.gmra.mxu1 %vm1595_vm6, %v1124_v33 }
 0x162   : > { %v772_v35 = vpop.f32.mrf.mxu0 }
 0x165   : > { %v786_v38 = vpop.f32.mrf.mxu1 }
 0x16a   : > { %v774_v44 = vpop.f32.mrf.mxu0 }
 0x16b   : > { %v758_v36 = vpop.f32.mrf.mxu3 }
 0x16c   : > { %v759_v37 = vadd.f32 %v758_v36, %v604_v34 }
 0x16d   : > { %v788_v46 = vpop.f32.mrf.mxu1 }
 0x16e   : > { %v773_v39 = vadd.f32 %v772_v35, %v759_v37 }
 0x170   : > { %v787_v40 = vadd.f32 %v786_v38, %v773_v39 }
 0x172   : > { %v791_v41 = vadd.f32 %v787_v40, %v1568_v22 }
 0x173   : > { %v760_v18 = vpop.f32.mrf.mxu3 }
 0x174   : > { %v793_v42 = vmax.f32 %v791_v41, 0.0  ;;  %v761_v43 = vadd.f32 %v760_v18, %v604_v34 }
 0x176   : > { %795 = vst [vmem:[%s250_s11] sm:$0xff] %v793_v42  ;;  %v775_v45 = vadd.f32 %v774_v44, %v761_v43 }
 0x178   : > { %v789_v47 = vadd.f32 %v788_v46, %v775_v45 }
 0x17a   : > { %v792_v22 = vadd.f32 %v789_v47, %v1571_v23 }
 0x17c   : > { %v794_v48 = vmax.f32 %v792_v22, 0.0 }
 0x17e   : > { %796 = vst [vmem:[%s250_s11 + $0x8] sm:$0xff] %v794_v48 }
 0x17f   : > { %1374 = shalt.err (!%p1371_p10)
}
 0x180   : > { %s1426_s28 = smov 128   ;;  %s1427_s21 = smov 8  }
 0x181   : > { %1193 = dma.vmem_to_hbm [thread:$0]  (%p1519_p3), %s811_s12, 256, %s813_s23, %s798_s19, %s1426_s28, %s1426_s28, %s1427_s21  }
 0x182 PF: > { %s827_s26 = sand.u32 1, %s1405_s15   ;;  %p1669_p12 = scmp.ge.s32.totalorder %s1417_s18, 2 }
 0x183   : > { %s828_s30 = scalar_lea.sflag [#allocation4], %s827_s26 }
 0x184   : > { %p1207_p13 = pnand %p1669_p12, %p1488_p6 }
 0x186   : > { %p1208_p0 = pneg %p1207_p13 }
 0x188   : > { %1400 = dma.done.wait (%p1208_p0), %s828_s30, 256  }
 0x189   : > { %1402 = vsyncadd (%p1208_p0), %s828_s30, 4294967040  ;;  %p18_p5 = scmp.ge.s32.totalorder %s1509_s10, 4   ;;  %s1670_s15 = smov %s1409_s16 }
 0x18a   : > { %s1671_s16 = smov %s1413_s17  ;;  %s1672_s17 = smov %s1525_s14 }
 0x18b   : > { %s1673_s18 = smov %s1509_s10  ;;  %20 = sbr.rel (!%p18_p5) target bundleno = 6 (0x6), region = 89 }
 0x190   :  { %834 = vsyncpa [#allocation3], 1 }
 0x191   :  { %836 = vsyncpa [#allocation3 + $0x1], 1 }
 0x192   :  { %837 = vsyncpa [#allocation6], 1 }
 0x193   :  { %838 = vsyncpa [#allocation4], 1 }
 0x194   :  { %840 = vsyncpa [#allocation4 + $0x1], 1 }

</bundles_post_ra>
